<compile_context>
chip_gen: v7x
topology: tpu7x:2x2x1
jax: 0.10.0
libtpu: 0.0.40
codegen_flags: <defaults>
</compile_context>

<pallas_src>
import functools
import math

import jax
import jax.numpy as jnp
from jax.experimental import pallas as pl
from jax.experimental.pallas import tpu as pltpu


def _round_up(a: int, b: int) -> int:
    return (a + b - 1) // b * b


def _device_kind() -> str:
    try:
        return jax.devices()[0].device_kind.lower()
    except Exception:
        return ""


def _vmem_capacity_bytes() -> int:
    try:
        cap = getattr(pltpu.get_tpu_info(), "vmem_capacity_bytes", None)
        if cap:
            return int(cap)
    except Exception:
        pass
    kind = _device_kind()
    if "v7" in kind or "7x" in kind:
        return 64 * (1 << 20)
    return 128 * (1 << 20)


def _elementwise_dtype():
    # v6e/v7x VPU + EUP have bf16 paths (halves vreg/VMEM for the hidden tile);
    # v5e and older do not, so keep the bias/GELU math in f32 there.
    kind = _device_kind()
    if "v6" in kind or "v7" in kind or "7x" in kind:
        return jnp.bfloat16
    return jnp.float32


def _prenorm_ff_kernel(x_ref, g_ref, beta_ref, w1_ref, b1_ref, w2_ref, b2_ref,
                       o_ref, xn_ref, acc_ref, *, true_d: int, eps: float,
                       ew_dtype, approximate_gelu: bool):
    # Grid: (row tiles i  [parallel], hidden tiles j  [arbitrary / reduction])
    # x_ref   : (TM, Dp)  f32   row tile (constant over j -> fetched once per i)
    # g_ref   : (1, Dp)   f32   LayerNorm gamma (zero-padded, resident)
    # beta_ref: (1, Dp)   f32   LayerNorm beta  (zero-padded, resident)
    # w1_ref  : (Dp, TH)  bf16  column block of W1
    # b1_ref  : (1, TH)   f32   block of b1
    # w2_ref  : (TH, Dp)  bf16  row block of W2
    # b2_ref  : (1, Dp)   f32   resident
    # xn_ref  : (TM, Dp)  bf16  scratch: LayerNormed rows (MXU input)
    # acc_ref : (TM, Dp)  f32   scratch: output accumulator over hidden tiles
    j = pl.program_id(1)

    # ---- LayerNorm once per row tile (j == 0) ------------------------------
    @pl.when(j == 0)
    def _():
        x = x_ref[...].astype(jnp.float32)
        inv_d = jnp.float32(1.0 / true_d)
        # Single-pass statistics: padded feature lanes of x are zero so they
        # contribute nothing to either sum; gamma/beta are zero-padded so the
        # padded lanes of xn end up exactly 0 (no iota / mask / where needed).
        s1 = jnp.sum(x, axis=-1, keepdims=True)
        s2 = jnp.sum(x * x, axis=-1, keepdims=True)
        mean = s1 * inv_d
        var = jnp.maximum(s2 * inv_d - mean * mean, 0.0)
        rstd = jax.lax.rsqrt(var + jnp.float32(eps))
        xn = (x - mean) * rstd * g_ref[...] + beta_ref[...]
        xn_ref[...] = xn.astype(xn_ref.dtype)
        acc_ref[...] = jnp.zeros_like(acc_ref)

    # ---- Linear 1 block (MXU bf16 in / f32 acc) + bias + GELU ---------------
    h = jnp.dot(xn_ref[...], w1_ref[...], preferred_element_type=jnp.float32)
    h = h.astype(ew_dtype) + b1_ref[...].astype(ew_dtype)
    if approximate_gelu:
        # tanh-approx GELU: routes the transcendental to the EUP slot.
        # TODO(synk): deviates from PyTorch nn.GELU()'s exact-erf by <~1e-3.
        h = jax.nn.gelu(h, approximate=True)
    else:
        hf = h.astype(jnp.float32)
        hf = 0.5 * hf * (1.0 + jax.lax.erf(hf * jnp.float32(1.0 / math.sqrt(2.0))))
        h = hf
    # Dropout(p=0.0) is identity -> no-op.

    # ---- Linear 2 block (MXU) accumulated over hidden tiles -----------------
    acc_ref[...] += jnp.dot(h.astype(jnp.bfloat16), w2_ref[...],
                            preferred_element_type=jnp.float32)

    @pl.when(j == pl.num_programs(1) - 1)
    def _():
        o_ref[...] = (acc_ref[...] + b2_ref[...]).astype(o_ref.dtype)


def prenorm_ff_pallas(x, gamma, beta, w1, b1, w2, b2, eps=1e-5,
                      approximate_gelu=True):
    """x: (batch, seq, dim). Returns (batch, seq, dim) in x.dtype."""
    B, S, D = x.shape
    H = w1.shape[1]
    M = B * S

    Dp = _round_up(D, 128)

    vmem_cap = _vmem_capacity_bytes()
    budget = (vmem_cap * 3) // 5             # headroom for double buffers/temps

    # --- hidden-dim tile: stream W1/W2 blocks when they cannot all be resident
    #     (e.g. large D*H on v7x's 64 MiB VMEM). ---
    def weight_bytes(th):                    # bf16 w1 + w2 blocks, double-buffered
        return 2 * (Dp * th + th * Dp) * 2

    TH = _round_up(H, 128)
    while TH > 128 and weight_bytes(TH) > budget // 2:
        TH = max(128, _round_up(TH // 2, 128))
    Hp = _round_up(H, TH)                    # guarantees Hp % TH == 0
    n_h = Hp // TH

    # --- row tile: multiple of 8; capped so the "parallel" row axis has >= 2
    #     grid steps when M allows it (so v7x's 2 TensorCores both get work). ---
    TM = min(512, _round_up(M, 8))
    if M >= 16:
        TM = min(TM, _round_up((M + 1) // 2, 8))

    def tile_bytes(tm):
        return (2 * tm * Dp * 4              # x tile (f32, double-buffered)
                + 2 * tm * Dp * 4            # out tile (f32, double-buffered)
                + tm * Dp * 2                # xn scratch (bf16)
                + tm * Dp * 4                # f32 accumulator scratch
                + 2 * tm * TH * 4)           # hidden intermediates / slack

    while TM > 8 and weight_bytes(TH) + tile_bytes(TM) > budget:
        TM = max(8, _round_up(TM // 2, 8))   # stays a multiple of 8
    Mp = _round_up(M, TM)
    n_m = Mp // TM

    # --- pad / cast inputs (pads skipped when they are no-ops) ---
    f32 = jnp.float32
    x2d = x.reshape(M, D).astype(f32)
    if (Mp, Dp) != (M, D):
        x2d = jnp.pad(x2d, ((0, Mp - M), (0, Dp - D)))

    def pad_vec(v, n):
        v = v.astype(f32)
        return v if v.shape[0] == n else jnp.pad(v, (0, n - v.shape[0]))

    g2d = pad_vec(gamma, Dp).reshape(1, Dp)
    bt2d = pad_vec(beta, Dp).reshape(1, Dp)
    b1p = pad_vec(b1, Hp).reshape(1, Hp)
    b2p = pad_vec(b2, Dp).reshape(1, Dp)
    w1p = w1 if w1.shape == (Dp, Hp) else jnp.pad(w1, ((0, Dp - D), (0, Hp - H)))
    w1p = w1p.astype(jnp.bfloat16)
    w2p = w2 if w2.shape == (Hp, Dp) else jnp.pad(w2, ((0, Hp - H), (0, Dp - D)))
    w2p = w2p.astype(jnp.bfloat16)

    # Advisory cost estimate for XLA scheduling around the custom call.
    cost = pl.CostEstimate(
        flops=4 * Mp * Dp * Hp + 10 * Mp * Dp,
        transcendentals=Mp * Hp,
        bytes_accessed=2 * Mp * Dp * 4 + 2 * Dp * Hp * 2 + (3 * Dp + Hp) * 4,
    )

    # Generation-aware scoped-VMEM limit (<= 3/4 of physical capacity).
    need = weight_bytes(TH) + tile_bytes(TM)
    vmem_limit = int(min(vmem_cap - vmem_cap // 4,
                         max(need + (4 << 20), 32 << 20)))

    kernel = functools.partial(
        _prenorm_ff_kernel, true_d=D, eps=eps,
        ew_dtype=_elementwise_dtype(), approximate_gelu=approximate_gelu)

    out2d = pl.pallas_call(
        kernel,
        out_shape=jax.ShapeDtypeStruct((Mp, Dp), x.dtype),
        grid=(n_m, n_h),                                   # rows, hidden-reduction
        in_specs=[
            pl.BlockSpec((TM, Dp), lambda i, j: (i, 0)),   # x row tile
            pl.BlockSpec((1, Dp), lambda i, j: (0, 0)),    # gamma   (resident)
            pl.BlockSpec((1, Dp), lambda i, j: (0, 0)),    # beta    (resident)
            pl.BlockSpec((Dp, TH), lambda i, j: (0, j)),   # W1 column block
            pl.BlockSpec((1, TH), lambda i, j: (0, j)),    # b1 block
            pl.BlockSpec((TH, Dp), lambda i, j: (j, 0)),   # W2 row block
            pl.BlockSpec((1, Dp), lambda i, j: (0, 0)),    # b2      (resident)
        ],
        out_specs=pl.BlockSpec((TM, Dp), lambda i, j: (i, 0)),
        scratch_shapes=[
            pltpu.VMEM((TM, Dp), jnp.bfloat16),            # LayerNormed rows
            pltpu.VMEM((TM, Dp), jnp.float32),             # output accumulator
        ],
        compiler_params=pltpu.CompilerParams(
            dimension_semantics=("parallel", "arbitrary"), # rows shard across TCs
            vmem_limit_bytes=vmem_limit,
        ),
        cost_estimate=cost,
    )(x2d, g2d, bt2d, w1p, b1p, w2p, b2p)

    return out2d[:M, :D].reshape(B, S, D)


def prenorm_ff_reference(x, gamma, beta, w1, b1, w2, b2, eps=1e-5,
                         approximate_gelu=True):
    mean = x.mean(-1, keepdims=True)
    var = ((x - mean) ** 2).mean(-1, keepdims=True)
    xn = (x - mean) / jnp.sqrt(var + eps) * gamma + beta
    h = xn @ w1 + b1
    if approximate_gelu:
        h = jax.nn.gelu(h, approximate=True)
    else:
        h = 0.5 * h * (1.0 + jax.lax.erf(h / jnp.sqrt(2.0)))
    return h @ w2 + b2


if __name__ == "__main__":
    # Small shapes consistent with the module: x (batch, seq, dim), hidden MLP dim.
    batch, seq, dim, hidden = 2, 8, 32, 64

    key = jax.random.PRNGKey(0)
    kx, kg, kb, kw1, kb1, kw2, kb2 = jax.random.split(key, 7)

    x = jax.random.normal(kx, (batch, seq, dim), dtype=jnp.float32)

    # LayerNorm affine (perturbed around the torch default gamma=1, beta=0).
    gamma = 1.0 + 0.1 * jax.random.normal(kg, (dim,), dtype=jnp.float32)
    beta = 0.1 * jax.random.normal(kb, (dim,), dtype=jnp.float32)

    # PyTorch-Linear-style init: U(-1/sqrt(fan_in), 1/sqrt(fan_in)).
    bound1 = 1.0 / math.sqrt(dim)
    bound2 = 1.0 / math.sqrt(hidden)
    w1 = jax.random.uniform(kw1, (dim, hidden), jnp.float32, -bound1, bound1)
    b1 = jax.random.uniform(kb1, (hidden,), jnp.float32, -bound1, bound1)
    w2 = jax.random.uniform(kw2, (hidden, dim), jnp.float32, -bound2, bound2)
    b2 = jax.random.uniform(kb2, (dim,), jnp.float32, -bound2, bound2)

    out = prenorm_ff_pallas(x, gamma, beta, w1, b1, w2, b2)
    jax.block_until_ready(out)

    ref = prenorm_ff_reference(x, gamma, beta, w1, b1, w2, b2)
    assert out.shape == ref.shape
    # bf16 matmul inputs / bf16 elementwise on newer chips => looser tolerance.
    assert jnp.allclose(out, ref, atol=2e-2, rtol=2e-2), "mismatch vs reference"

    print("KERNEL_OK")
</pallas_src>

<mosaic_0001>
module attributes {stable_mosaic.version = 11 : i64} {
  func.func @_prenorm_ff_kernel(%arg0: i32, %arg1: i32, %arg2: memref<8x128xf32, #tpu.memory_space<vmem>>, %arg3: memref<1x128xf32, #tpu.memory_space<vmem>>, %arg4: memref<1x128xf32, #tpu.memory_space<vmem>>, %arg5: memref<128x128xbf16, #tpu.memory_space<vmem>>, %arg6: memref<1x128xf32, #tpu.memory_space<vmem>>, %arg7: memref<128x128xbf16, #tpu.memory_space<vmem>>, %arg8: memref<1x128xf32, #tpu.memory_space<vmem>>, %arg9: memref<8x128xf32, #tpu.memory_space<vmem>>, %arg10: memref<8x128xbf16, #tpu.memory_space<vmem>>, %arg11: memref<8x128xf32, #tpu.memory_space<vmem>>) attributes {dimension_semantics = [#tpu.dimension_semantics<parallel>, #tpu.dimension_semantics<arbitrary>], iteration_bounds = array<i64: 2, 1>, scalar_prefetch = 0 : i64, scratch_operands = 2 : i64, tpu.core_type = #tpu.core_type<tc>, window_params = [{transform_indices = @transform_0, window_bounds = array<i64: 8, 128>}, {pipeline_mode = #tpu.pipeline_mode<synchronous>, transform_indices = @transform_1, window_bounds = array<i64: 1, 128>}, {pipeline_mode = #tpu.pipeline_mode<synchronous>, transform_indices = @transform_2, window_bounds = array<i64: 1, 128>}, {transform_indices = @transform_3, window_bounds = array<i64: 128, 128>}, {transform_indices = @transform_4, window_bounds = array<i64: 1, 128>}, {transform_indices = @transform_5, window_bounds = array<i64: 128, 128>}, {pipeline_mode = #tpu.pipeline_mode<synchronous>, transform_indices = @transform_6, window_bounds = array<i64: 1, 128>}, {transform_indices = @transform_7, window_bounds = array<i64: 8, 128>}]} {
    %c0_i32 = arith.constant 0 : i32
    %0 = arith.cmpi eq, %arg1, %c0_i32 : i32
    %1 = arith.extui %0 : i1 to i32
    %c0_i32_0 = arith.constant 0 : i32
    %2 = arith.cmpi ne, %1, %c0_i32_0 : i32
    scf.if %2 {
      %c0_19 = arith.constant 0 : index
      %c0_20 = arith.constant 0 : index
      %31 = vector.load %arg2[%c0_19, %c0_20] : memref<8x128xf32, #tpu.memory_space<vmem>>, vector<8x128xf32>
      %cst_21 = arith.constant dense<0.000000e+00> : vector<8xf32>
      %32 = vector.multi_reduction <add>, %31, %cst_21 [1] : vector<8x128xf32> to vector<8xf32>
      %33 = vector.shape_cast %32 : vector<8xf32> to vector<8x1xf32>
      %34 = arith.mulf %31, %31 : vector<8x128xf32>
      %cst_22 = arith.constant dense<0.000000e+00> : vector<8xf32>
      %35 = vector.multi_reduction <add>, %34, %cst_22 [1] : vector<8x128xf32> to vector<8xf32>
      %36 = vector.shape_cast %35 : vector<8xf32> to vector<8x1xf32>
      %cst_23 = arith.constant 3.125000e-02 : f32
      %37 = vector.broadcast %cst_23 : f32 to vector<8x1xf32>
      %38 = arith.mulf %33, %37 : vector<8x1xf32>
      %cst_24 = arith.constant 3.125000e-02 : f32
      %39 = vector.broadcast %cst_24 : f32 to vector<8x1xf32>
      %40 = arith.mulf %36, %39 : vector<8x1xf32>
      %41 = arith.mulf %38, %38 : vector<8x1xf32>
      %42 = arith.subf %40, %41 : vector<8x1xf32>
      %cst_25 = arith.constant 0.000000e+00 : f32
      %43 = vector.broadcast %cst_25 : f32 to vector<8x1xf32>
      %44 = arith.maximumf %42, %43 : vector<8x1xf32>
      %cst_26 = arith.constant 9.99999974E-6 : f32
      %45 = vector.broadcast %cst_26 : f32 to vector<8x1xf32>
      %46 = arith.addf %44, %45 : vector<8x1xf32>
      %47 = math.rsqrt %46 : vector<8x1xf32>
      %48 = vector.broadcast %38 : vector<8x1xf32> to vector<8x128xf32>
      %49 = arith.subf %31, %48 : vector<8x128xf32>
      %50 = vector.broadcast %47 : vector<8x1xf32> to vector<8x128xf32>
      %51 = arith.mulf %49, %50 : vector<8x128xf32>
      %c0_27 = arith.constant 0 : index
      %c0_28 = arith.constant 0 : index
      %52 = vector.load %arg3[%c0_27, %c0_28] : memref<1x128xf32, #tpu.memory_space<vmem>>, vector<1x128xf32>
      %53 = vector.broadcast %52 : vector<1x128xf32> to vector<8x128xf32>
      %54 = arith.mulf %51, %53 : vector<8x128xf32>
      %c0_29 = arith.constant 0 : index
      %c0_30 = arith.constant 0 : index
      %55 = vector.load %arg4[%c0_29, %c0_30] : memref<1x128xf32, #tpu.memory_space<vmem>>, vector<1x128xf32>
      %56 = vector.broadcast %55 : vector<1x128xf32> to vector<8x128xf32>
      %57 = arith.addf %54, %56 : vector<8x128xf32>
      %58 = arith.truncf %57 : vector<8x128xf32> to vector<8x128xbf16>
      %c0_31 = arith.constant 0 : index
      %c0_32 = arith.constant 0 : index
      %59 = vector.load %arg10[%c0_31, %c0_32] : memref<8x128xbf16, #tpu.memory_space<vmem>>, vector<8x128xbf16>
      tpu.vector_store %arg10[%c0_31, %c0_32], %58 {strides = array<i32>} : memref<8x128xbf16, #tpu.memory_space<vmem>>, vector<8x128xbf16>,
      %cst_33 = arith.constant 0.000000e+00 : f32
      %60 = vector.broadcast %cst_33 : f32 to vector<8x128xf32>
      %c0_34 = arith.constant 0 : index
      %c0_35 = arith.constant 0 : index
      %61 = vector.load %arg11[%c0_34, %c0_35] : memref<8x128xf32, #tpu.memory_space<vmem>>, vector<8x128xf32>
      tpu.vector_store %arg11[%c0_34, %c0_35], %60 {strides = array<i32>} : memref<8x128xf32, #tpu.memory_space<vmem>>, vector<8x128xf32>,
    } else {
    }
    %c0 = arith.constant 0 : index
    %c0_1 = arith.constant 0 : index
    %3 = vector.load %arg10[%c0, %c0_1] : memref<8x128xbf16, #tpu.memory_space<vmem>>, vector<8x128xbf16>
    %c0_2 = arith.constant 0 : index
    %c0_3 = arith.constant 0 : index
    %4 = vector.load %arg5[%c0_2, %c0_3] : memref<128x128xbf16, #tpu.memory_space<vmem>>, vector<128x128xbf16>
    %cst = arith.constant dense<0.000000e+00> : vector<8x128xf32>
    %5 = tpu.matmul %3, %4, %cst {dimension_numbers = #tpu.dot_dimension_numbers<[1], [0], [0], [1], [0, 0, 1, 1], [], []>} : vector<8x128xbf16>, vector<128x128xbf16>, vector<8x128xf32> -> vector<8x128xf32>
    %c0_4 = arith.constant 0 : index
    %c0_5 = arith.constant 0 : index
    %6 = vector.load %arg6[%c0_4, %c0_5] : memref<1x128xf32, #tpu.memory_space<vmem>>, vector<1x128xf32>
    %7 = vector.broadcast %6 : vector<1x128xf32> to vector<8x128xf32>
    %8 = arith.addf %5, %7 : vector<8x128xf32>
    %9 = arith.mulf %8, %8 : vector<8x128xf32>
    %10 = arith.mulf %8, %9 : vector<8x128xf32>
    %cst_6 = arith.constant 4.471500e-02 : f32
    %11 = vector.broadcast %cst_6 : f32 to vector<8x128xf32>
    %12 = arith.mulf %11, %10 : vector<8x128xf32>
    %13 = arith.addf %8, %12 : vector<8x128xf32>
    %cst_7 = arith.constant 0.797884583 : f32
    %14 = vector.broadcast %cst_7 : f32 to vector<8x128xf32>
    %15 = arith.mulf %14, %13 : vector<8x128xf32>
    %16 = math.tanh %15 : vector<8x128xf32>
    %cst_8 = arith.constant 1.000000e+00 : f32
    %17 = vector.broadcast %cst_8 : f32 to vector<8x128xf32>
    %18 = arith.addf %17, %16 : vector<8x128xf32>
    %cst_9 = arith.constant 5.000000e-01 : f32
    %19 = vector.broadcast %cst_9 : f32 to vector<8x128xf32>
    %20 = arith.mulf %19, %18 : vector<8x128xf32>
    %21 = arith.mulf %8, %20 : vector<8x128xf32>
    %c0_10 = arith.constant 0 : index
    %c0_11 = arith.constant 0 : index
    %22 = vector.load %arg11[%c0_10, %c0_11] : memref<8x128xf32, #tpu.memory_space<vmem>>, vector<8x128xf32>
    %23 = arith.truncf %21 : vector<8x128xf32> to vector<8x128xbf16>
    %c0_12 = arith.constant 0 : index
    %c0_13 = arith.constant 0 : index
    %24 = vector.load %arg7[%c0_12, %c0_13] : memref<128x128xbf16, #tpu.memory_space<vmem>>, vector<128x128xbf16>
    %cst_14 = arith.constant dense<0.000000e+00> : vector<8x128xf32>
    %25 = tpu.matmul %23, %24, %cst_14 {dimension_numbers = #tpu.dot_dimension_numbers<[1], [0], [0], [1], [0, 0, 1, 1], [], []>} : vector<8x128xbf16>, vector<128x128xbf16>, vector<8x128xf32> -> vector<8x128xf32>
    %26 = arith.addf %22, %25 : vector<8x128xf32>
    %c0_15 = arith.constant 0 : index
    %c0_16 = arith.constant 0 : index
    %27 = vector.load %arg11[%c0_15, %c0_16] : memref<8x128xf32, #tpu.memory_space<vmem>>, vector<8x128xf32>
    tpu.vector_store %arg11[%c0_15, %c0_16], %26 {strides = array<i32>} : memref<8x128xf32, #tpu.memory_space<vmem>>, vector<8x128xf32>,
    %c0_i32_17 = arith.constant 0 : i32
    %28 = arith.cmpi eq, %arg1, %c0_i32_17 : i32
    %29 = arith.extui %28 : i1 to i32
    %c0_i32_18 = arith.constant 0 : i32
    %30 = arith.cmpi ne, %29, %c0_i32_18 : i32
    scf.if %30 {
      %c0_19 = arith.constant 0 : index
      %c0_20 = arith.constant 0 : index
      %31 = vector.load %arg11[%c0_19, %c0_20] : memref<8x128xf32, #tpu.memory_space<vmem>>, vector<8x128xf32>
      %c0_21 = arith.constant 0 : index
      %c0_22 = arith.constant 0 : index
      %32 = vector.load %arg8[%c0_21, %c0_22] : memref<1x128xf32, #tpu.memory_space<vmem>>, vector<1x128xf32>
      %33 = vector.broadcast %32 : vector<1x128xf32> to vector<8x128xf32>
      %34 = arith.addf %31, %33 : vector<8x128xf32>
      %c0_23 = arith.constant 0 : index
      %c0_24 = arith.constant 0 : index
      %35 = vector.load %arg9[%c0_23, %c0_24] : memref<8x128xf32, #tpu.memory_space<vmem>>, vector<8x128xf32>
      tpu.vector_store %arg9[%c0_23, %c0_24], %34 {strides = array<i32>} : memref<8x128xf32, #tpu.memory_space<vmem>>, vector<8x128xf32>,
    } else {
    }
    return
  }
  func.func @transform_0(%arg0: i32, %arg1: i32) -> (i32, i32) {
    %c0_i32 = arith.constant 0 : i32
    %c0_i32_0 = arith.constant 0 : i32
    return %arg0, %c0_i32 : i32, i32
  }
  func.func @transform_1(%arg0: i32, %arg1: i32) -> (i32, i32) {
    %c0_i32 = arith.constant 0 : i32
    %c0_i32_0 = arith.constant 0 : i32
    %c0_i32_1 = arith.constant 0 : i32
    return %c0_i32, %c0_i32_0 : i32, i32
  }
  func.func @transform_2(%arg0: i32, %arg1: i32) -> (i32, i32) {
    %c0_i32 = arith.constant 0 : i32
    %c0_i32_0 = arith.constant 0 : i32
    %c0_i32_1 = arith.constant 0 : i32
    return %c0_i32, %c0_i32_0 : i32, i32
  }
  func.func @transform_3(%arg0: i32, %arg1: i32) -> (i32, i32) {
    %c0_i32 = arith.constant 0 : i32
    %c0_i32_0 = arith.constant 0 : i32
    return %c0_i32, %arg1 : i32, i32
  }
  func.func @transform_4(%arg0: i32, %arg1: i32) -> (i32, i32) {
    %c0_i32 = arith.constant 0 : i32
    %c0_i32_0 = arith.constant 0 : i32
    return %c0_i32, %arg1 : i32, i32
  }
  func.func @transform_5(%arg0: i32, %arg1: i32) -> (i32, i32) {
    %c0_i32 = arith.constant 0 : i32
    %c0_i32_0 = arith.constant 0 : i32
    return %arg1, %c0_i32 : i32, i32
  }
  func.func @transform_6(%arg0: i32, %arg1: i32) -> (i32, i32) {
    %c0_i32 = arith.constant 0 : i32
    %c0_i32_0 = arith.constant 0 : i32
    %c0_i32_1 = arith.constant 0 : i32
    return %c0_i32, %c0_i32_0 : i32, i32
  }
  func.func @transform_7(%arg0: i32, %arg1: i32) -> (i32, i32) {
    %c0_i32 = arith.constant 0 : i32
    %c0_i32_0 = arith.constant 0 : i32
    return %arg0, %c0_i32 : i32, i32
  }
}

</mosaic_0001>

<bundles_post_ra>
// kernel: tpu_custom_call.1
= control target key start
LH: loop header
LB: loop body
LE: loop exit
PB: predicated region body
PF: predicated region fallthrough
CT: control target
= control target key end

     0   :  { %12 = vsyncpa [#allocation5], 0  ;;  %s1482_s0 = inlined_call_operand.hbm [shape: f32[16,128], index: 0, kind: input, shape index: {}]   ;;  %s1483_s1 = inlined_call_operand.vmem [shape: f32[1,128], index: 1, kind: input, shape index: {}]   ;;  %s1484_s2 = inlined_call_operand.vmem [shape: f32[1,128], index: 2, kind: input, shape index: {}]   ;;  %s1485_s3 = inlined_call_operand.hbm [shape: bf16[128,128], index: 3, kind: input, shape index: {}]   ;;  %s1486_s4 = inlined_call_operand.vmem [shape: f32[1,128], index: 4, kind: input, shape index: {}]   ;;  %s1487_s5 = inlined_call_operand.hbm [shape: bf16[128,128], index: 5, kind: input, shape index: {}]   ;;  %s1488_s6 = inlined_call_operand.vmem [shape: f32[1,128], index: 6, kind: input, shape index: {}]   ;;  %s1489_s7 = inlined_call_operand.hbm [shape: f32[16,128], index: 7, kind: output, shape index: {}]  }
   0x1   :  { %14 = vsyncpa [#allocation5 + $0x1], 0 }
   0x2   :  { %15 = vsyncpa [#allocation8], 0 }
   0x3   :  { %16 = vsyncpa [#allocation6], 0 }
   0x4   :  { %18 = vsyncpa [#allocation6 + $0x1], 0  ;;  %s1198_s24 = smov 0   ;;  %s1200_s25 = smov 0  }
   0x5   :  { %s1202_s26 = smov 0   ;;  %s1204_s27 = smov 0  }
   0x6   :  { %s1206_s28 = smov 0   ;;  %s1208_s29 = smov 0  }
   0x7 LB: > { %1496 = sst [smem:[#allocation14_spill]] %s1128_s24  ;;  %s773_s30 = sadd.s32 4294967295, %s1148_s29   ;;  %s1148_s29 = sphi %s1208_s29, %s24_s29   ;;  %s1144_s28 = sphi %s1206_s28, %s1517_s28   ;;  %s1140_s27 = sphi %s1204_s27, %s1516_s27   ;;  %s1136_s26 = sphi %s1202_s26, %s1515_s26   ;;  %s1132_s25 = sphi %s1200_s25, %s1514_s25   ;;  %s1128_s24 = sphi %s1198_s24, %s1513_s24  }
   0x8   : > { %s774_s8 = sadd.s32 4294967294, %s1148_s29   ;;  %p56_p0 = scmp.ne.s32.totalorder %s1132_s25, %s1128_s24 }
   0x9   : > { %p1232_p1 = scmp.eq.s32.totalorder %s773_s30, 0  ;;  %p1236_p2 = scmp.eq.s32.totalorder %s773_s30, 1 }
   0xa   : > { %p227_p3 = scmp.eq.s32.totalorder %s774_s8, 1  ;;  %p775_p5 = scmp.ge.s32.totalorder %s1148_s29, 1 }
   0xb   : > { %s1497_s9 = scalar_select %p1232_p1, 1, 0 }
   0xc   : > { %p1242_p4 = por %p1232_p1, %p56_p0  ;;  %p1247_p6 = por %p227_p3, %p56_p0 }
   0xd   : > { %p234_p7 = scmp.lt.s32.totalorder %s1148_s29, 3  ;;  %s1150_s14 = smov [#allocation7]  }
   0xe   : > { %s1499_s11 = scalar_select %p1242_p4, 1, 0 }
   0xf   : > { %s1500_s12 = scalar_select %p1247_p6, 1, 0 }
  0x10   : > { %p1252_p8 = pnand %p775_p5, %p234_p7  ;;  %s254_s15 = sshll.u32 %s1150_s14, 4  ;;  %s1256_s15 = int_to_ptr.vmem [resolvable:$true] %s254_s15 }
  0x11   : > { %1501 = sst [smem:[#allocation15_spill]] %s1500_s12  ;;  %s1151_s17 = smov [#allocation9]  }
  0x12   : > { %p881_p9 = pneg %p1252_p8  ;;  %s276_s18 = sshll.u32 %s1151_s17, 4  ;;  %s1267_s18 = int_to_ptr.vmem [resolvable:$true] %s276_s18 }
  0x13   : > { %s976_s21 = scalar_lea.hbm %s1485_s3, 1024 }
  0x14   : > { %p1263_p11 = pnand %p881_p9, %p1232_p1  ;;  %p977_p12 = scmp.ne.s32.totalorder %s1485_s3, %s976_s21 }
  0x15   : > { %p983_p5 = scmp.lt.u32.totalorder %s976_s21, %s1485_s3 }
  0x16   : > { %p978_p13 = pneg %p1263_p11 }
  0x18   : > { %p979_p0 = pnand %p978_p13, %p977_p12 }
  0x1a   : > { %p980_p3 = pneg %p979_p0 }
  0x1c   : > { %p985_p7 = pnand %p983_p5, %p980_p3 }
  0x1e   : > { %988 = shalt.err (!%p985_p7)
}
  0x1f   : > { %s989_s14 = scalar_lea.vmem %s1256_s15, 1024  ;;  %p997_p1 = scmp.lt.s32.totalorder %s1256_s15, %s1256_s15 }
  0x20   : > { %p990_p9 = scmp.ne.s32.totalorder %s1256_s15, %s989_s14  ;;  %p998_p12 = scmp.lt.s32.totalorder %s989_s14, %s989_s14 }
  0x22   : > { %p992_p10 = pnand %p990_p9, %p978_p13  ;;  %p999_p0 = por %p998_p12, %p997_p1 }
  0x24   : > { %p993_p6 = pneg %p992_p10 }
  0x26   : > { %p1000_p4 = pnand %p999_p0, %p993_p6 }
  0x28   : > { %1003 = shalt.err (!%p1000_p4)
}
  0x29   : > { %s1152_s17 = smov 64   ;;  %s1153_s19 = smov 4  }
  0x2a   : > { %884 = dma.hbm_to_vmem [thread:$0]  (!%p1263_p11), %s1485_s3, 1024, %s1256_s15, [#allocation8], %s1152_s17, %s1152_s17, %s1153_s19  }
  0x2b   : > { %s1004_s30 = scalar_lea.hbm %s1487_s5, 1024 }
  0x2c   : > { %p1005_p1 = scmp.ne.s32.totalorder %s1487_s5, %s1004_s30  ;;  %p1011_p10 = scmp.lt.u32.totalorder %s1004_s30, %s1487_s5 }
  0x2e   : > { %p1007_p4 = pnand %p1005_p1, %p978_p13 }
  0x30   : > { %p1008_p6 = pneg %p1007_p4 }
  0x32   : > { %p1013_p3 = pnand %p1011_p10, %p1008_p6 }
  0x34   : > { %1016 = shalt.err (!%p1013_p3)
}
  0x35   : > { %s1017_s15 = scalar_lea.vmem %s1267_s18, 1024  ;;  %p1025_p12 = scmp.lt.s32.totalorder %s1267_s18, %s1267_s18 }
  0x36   : > { %p1018_p5 = scmp.ne.s32.totalorder %s1267_s18, %s1017_s15  ;;  %p1026_p0 = scmp.lt.s32.totalorder %s1017_s15, %s1017_s15 }
  0x38   : > { %p1020_p7 = pnand %p1018_p5, %p978_p13  ;;  %p1027_p1 = por %p1026_p0, %p1025_p12 }
  0x3a   : > { %p1021_p9 = pneg %p1020_p7 }
  0x3c   : > { %p1028_p4 = pnand %p1027_p1, %p1021_p9 }
  0x3e   : > { %1031 = shalt.err (!%p1028_p4)
}
  0x3f   : > { %887 = dma.hbm_to_vmem [thread:$0]  (!%p1263_p11), %s1487_s5, 1024, %s1267_s18, [#allocation8], %s1152_s17, %s1152_s17, %s1153_s19  }
  0x40   : > { %s36_s20 = sadd.s32 1, %s1144_s28  ;;  %s43_s21 = sadd.s32 1, %s1136_s26 }
  0x41   : > { %p38_p13 = scmp.ge.s32.totalorder %s36_s20, 2  ;;  %p50_p6 = scmp.ne.s32.totalorder %s1136_s26, %s1132_s25 }
  0x42   : > { %p51_p10 = scmp.eq.s32.totalorder %s1148_s29, 0  ;;  %p898_p3 = scmp.lt.s32.totalorder %s1148_s29, 2 }
  0x43   : > { %s1519_s20 = smov (%p38_p13, %s36_s20), 0  ;;  %p1331_p7 = por %p1236_p2, %p50_p6 }
  0x44   : > { %p52_p5 = por %p51_p10, %p50_p6  ;;  %s40_s22 = ssub.s32 %s1144_s28, %s1519_s20 }
  0x45   : > { %s1504_s16 = scalar_select %p1331_p7, 1, 0 }
  0x46   : > { %s293_s23 = sand.u32 1, %s1136_s26   ;;  %p41_p9 = scmp.eq.s32.totalorder %s40_s22, 0 }
  0x47   : > { %s780_s18 = sshll.u32 %s293_s23, 3  ;;  %s781_s17 = sshll.u32 %s1144_s28, 7 }
  0x48   : > { %s1340_s19 = scalar_select %p41_p9, %s1136_s26, %s43_s21  }
  0x49   : > { %s1345_s14 = scalar_lea.hbm %s1482_s0, %s781_s17  ;;  %s297_s10 = scalar_lea.vmem [#allocation4], %s780_s18 }
  0x4a   : > { %s304_s15 = sshll.u32 %s297_s10, 4  ;;  %p1349_p2 = pnand %p898_p3, %p52_p5  ;;  %s1353_s15 = int_to_ptr.vmem [resolvable:$true] %s304_s15 }
  0x4b   : > { %s294_s12 = scalar_lea.sflag [#allocation5], %s293_s23  ;;  %s1032_s21 = scalar_lea.hbm %s1345_s14, 128 }
  0x4c   : > { %p1033_p11 = scmp.ne.s32.totalorder %s1345_s14, %s1032_s21  ;;  %p1034_p12 = pneg %p1349_p2 }
  0x4d   : > { %s1037_s17 = scalar_lea.hbm %s1482_s0, 256  ;;  %p1038_p4 = scmp.lt.u32.totalorder %s1345_s14, %s1482_s0 }
  0x4e   : > { %p1035_p0 = pnand %p1034_p12, %p1033_p11  ;;  %p1039_p13 = scmp.lt.u32.totalorder %s1037_s17, %s1032_s21 }
  0x4f   : > { %p1041_p10 = scmp.lt.u32.totalorder %s1032_s21, %s1345_s14 }
  0x50   : > { %p1036_p1 = pneg %p1035_p0  ;;  %p1040_p6 = por %p1039_p13, %p1038_p4 }
  0x52   : > { %p1042_p3 = por %p1041_p10, %p1040_p6 }
  0x54   : > { %p1043_p5 = pnand %p1042_p3, %p1036_p1 }
  0x56   : > { %1046 = shalt.err (!%p1043_p5)
}
  0x57   : > { %s1047_s23 = scalar_lea.vmem %s1353_s15, 128  ;;  %s1154_s10 = smov [#allocation4]  }
  0x58   : > { %p1048_p9 = scmp.ne.s32.totalorder %s1353_s15, %s1047_s23  ;;  %s1052_s22 = sshll.u32 %s1154_s10, 4  ;;  %s1053_s22 = int_to_ptr.vmem [resolvable:$false] %s1052_s22 }
  0x59   : > { %s1054_s18 = scalar_lea.vmem %s1053_s22, 256  ;;  %p1055_p7 = scmp.lt.s32.totalorder %s1353_s15, %s1053_s22 }
  0x5a   : > { %p1050_p11 = pnand %p1048_p9, %p1034_p12  ;;  %p1056_p4 = scmp.lt.s32.totalorder %s1054_s18, %s1047_s23 }
  0x5c   : > { %p1051_p0 = pneg %p1050_p11  ;;  %p1057_p13 = por %p1056_p4, %p1055_p7 }
  0x5e   : > { %p1058_p6 = pnand %p1057_p13, %p1051_p0 }
  0x60   : > { %1061 = shalt.err (!%p1058_p6)
}
  0x61   : > { %891 = dma.hbm_to_vmem [thread:$0]  (!%p1349_p2), %s1345_s14, 128, %s1353_s15, %s294_s12  }
  0x62   : > { %313 = sbr.rel (%p1252_p8) target bundleno = 762 (0x2fa), region = 48  ;;  %s1383_s21 = sand.u32 (!%p1252_p8), 1, %s1132_s25  }
  0x63   : > { %s783_s17 = sshll.u32 (!%p1252_p8), %s1383_s21, 3  ;;  %s316_s30 = scalar_lea.sflag (!%p1252_p8), [#allocation5], %s1383_s21 }
  0x64   : > { %s319_s8 = scalar_lea.vmem (!%p1252_p8), [#allocation4], %s783_s17  ;;  %p1506_p7 = scmp.ne.s32.totalorder (!%p1252_p8), %s1499_s11, 0 }
  0x69   : > { %1115 = dma.done.wait (%p1506_p7), %s316_s30, 128  }
  0x6a   : > { %1117 = vsyncadd (%p1506_p7), %s316_s30, 4294967168  ;;  %p1507_p2 = scmp.ne.s32.totalorder %s1497_s9, 0 }
  0x6c   : > { %1119 = dma.done.wait (%p1507_p2), [#allocation8], 2048  }
  0x6d   : > { %1121 = vsyncadd (%p1507_p2), [#allocation8], 4294965248  ;;  %v370_v0 = vld [vmem:[%s319_s8] sm:$0xff]  ;;  %v956_v2 = vld [vmem:[#allocation7] sm:$0xff]   ;;  %v1155_v3 = vmov 0.0   ;;  %vm1156_vm0 = vmmov 0  }
  0x6e   : > { %371 = vadd.xlane.f32.xlu0 %v370_v0  ;;  %v373_v1 = vmul.f32 %v370_v0, %v370_v0  ;;  %829 = vmatprep.subr.bf16.mxu0 %v1155_v3  ;;  %v957_v4 = vld [vmem:[#allocation7 + $0x8] sm:$0xff]   ;;  %v958_v5 = vld [vmem:[#allocation7 + $0x10] sm:$0xff]   ;;  %v959_v6 = vld [vmem:[#allocation7 + $0x18] sm:$0xff]   ;;  %s808_s10 = sshll.u32 %s1140_s27, 7  ;;  %s360_s22 = scalar_lea.vmem [#allocation10], %s783_s17 }
  0x6f   : > { %849 = vmatprep.subr.bf16.mxu1 %v1155_v3  ;;  %830 = vmatpush3.bf16.msra.mxu0 %v956_v2  ;;  %v960_v7 = vld [vmem:[#allocation7 + $0x20] sm:$0xff]   ;;  %v961_v8 = vld [vmem:[#allocation7 + $0x28] sm:$0xff]   ;;  %v962_v9 = vld [vmem:[#allocation7 + $0x30] sm:$0xff]   ;;  %s660_s18 = sshll.u32 %s360_s22, 4  ;;  %s1433_s9 = scalar_lea.hbm %s1489_s7, %s808_s10  ;;  %s1435_s18 = int_to_ptr.vmem [resolvable:$true] %s660_s18 }
  0x70   : > { %831 = vmatprep.subr.bf16.mxu0 %v1155_v3  ;;  %v963_v10 = vld [vmem:[#allocation7 + $0x38] sm:$0xff]   ;;  %845 = vmatprep.mubr.msk.bf16.mxu0 %vm1156_vm0, %v1155_v3  ;;  %v787_v21 = vld [vmem:[%s1483_s1] ss:$0 sm:$0xff]  ;;  %v964_v28 = vld [vmem:[#allocation9] sm:$0xff]   ;;  %s647_s27 = scalar_lea.sflag [#allocation6], %s1383_s21  ;;  %s1062_s11 = scalar_lea.vmem %s1435_s18, 128 }
  0x71   : > { %865 = vmatprep.mubr.msk.bf16.mxu1 %vm1156_vm0, %v1155_v3  ;;  %v788_v23 = vld [vmem:[%s1484_s2] ss:$0 sm:$0xff]  ;;  %850 = vmatpush3.bf16.msra.mxu1 %v964_v28  ;;  %v966_v30 = vld [vmem:[#allocation9 + $0x10] sm:$0xff]   ;;  %v967_v31 = vld [vmem:[#allocation9 + $0x18] sm:$0xff]   ;;  %p1063_p8 = scmp.ne.s32.totalorder %s1435_s18, %s1062_s11  ;;  %p1508_p12 = scmp.ne.s32.totalorder %s1504_s16, 0 }
  0x72   : > { %374 = vadd.xlane.f32.xlu0 %v373_v1  ;;  %851 = vmatprep.subr.bf16.mxu1 %v1155_v3  ;;  %v965_v29 = vld [vmem:[#allocation9 + $0x8] sm:$0xff]   ;;  %v968_v32 = vld [vmem:[#allocation9 + $0x20] sm:$0xff]   ;;  %v970_v34 = vld [vmem:[#allocation9 + $0x30] sm:$0xff]   ;;  %s1157_s17 = smov [#allocation10]  }
  0x73   : > { %832 = vmatpush3.bf16.msra.mxu0 %v957_v4  ;;  %v969_v33 = vld [vmem:[#allocation9 + $0x28] sm:$0xff]   ;;  %v971_v35 = vld [vmem:[#allocation9 + $0x38] sm:$0xff]   ;;  %p1064_p1 = pnand %p1063_p8, %p1508_p12  ;;  %s1066_s13 = sshll.u32 %s1157_s17, 4  ;;  %s1067_s13 = int_to_ptr.vmem [resolvable:$false] %s1066_s13 }
  0x74   : > { %833 = vmatprep.subr.bf16.mxu0 %v1155_v3  ;;  %v789_v36 = vld [vmem:[%s1486_s4] ss:$0 sm:$0xff]  ;;  %s1068_s14 = scalar_lea.vmem %s1067_s13, 256  ;;  %p1069_p3 = scmp.lt.s32.totalorder %s1435_s18, %s1067_s13 }
  0x75   : > { %852 = vmatpush3.bf16.msra.mxu1 %v965_v29  ;;  %v806_v52 = vld [vmem:[%s1488_s6] ss:$0 sm:$0xff]  ;;  %p1065_p10 = pneg %p1064_p1  ;;  %p1070_p5 = scmp.lt.s32.totalorder %s1068_s14, %s1062_s11 }
  0x76   : > { %853 = vmatprep.subr.bf16.mxu1 %v1155_v3 }
  0x77   : > { %834 = vmatpush3.bf16.msra.mxu0 %v958_v5  ;;  %p1071_p9 = por %p1070_p5, %p1069_p3 }
  0x78   : > { %835 = vmatprep.subr.bf16.mxu0 %v1155_v3 }
  0x79   : > { %854 = vmatpush3.bf16.msra.mxu1 %v966_v30  ;;  %p1072_p11 = pnand %p1071_p9, %p1065_p10 }
  0x7a   : > { %855 = vmatprep.subr.bf16.mxu1 %v1155_v3 }
  0x7b   : > { %836 = vmatpush3.bf16.msra.mxu0 %v959_v6 }
  0x7c   : > { %837 = vmatprep.subr.bf16.mxu0 %v1155_v3 }
  0x7d   : > { %856 = vmatpush3.bf16.msra.mxu1 %v967_v31 }
  0x7e   : > { %857 = vmatprep.subr.bf16.mxu1 %v1155_v3 }
  0x7f   : > { %838 = vmatpush3.bf16.msra.mxu0 %v960_v7 }
  0x80   : > { %839 = vmatprep.subr.bf16.mxu0 %v1155_v3 }
  0x81   : > { %858 = vmatpush3.bf16.msra.mxu1 %v968_v32 }
  0x82   : > { %859 = vmatprep.subr.bf16.mxu1 %v1155_v3 }
  0x83   : > { %840 = vmatpush3.bf16.msra.mxu0 %v961_v8 }
  0x84   : > { %841 = vmatprep.subr.bf16.mxu0 %v1155_v3 }
  0x85   : > { %860 = vmatpush3.bf16.msra.mxu1 %v969_v33 }
  0x86   : > { %861 = vmatprep.subr.bf16.mxu1 %v1155_v3 }
  0x87   : > { %842 = vmatpush3.bf16.msra.mxu0 %v962_v9 }
  0x88   : > { %843 = vmatprep.subr.bf16.mxu0 %v1155_v3 }
  0x89   : > { %862 = vmatpush3.bf16.msra.mxu1 %v970_v34 }
  0x8a   : > { %863 = vmatprep.subr.bf16.mxu1 %v1155_v3 }
  0x8b   : > { %844 = vmatpush3.bf16.msra.mxu0 %v963_v10 }
  0x8d   : > { %864 = vmatpush3.bf16.msra.mxu1 %v971_v35 }
  0xfb   : > { %v372_v11 = vpop.xlane.xlu0 %371 }
  0xfc   : > { %v376_v12 = vmul.f32 0.03125, %v372_v11 }
  0xfe   : > { %v378_v14 = vmul.f32 %v376_v12, %v376_v12  ;;  %v383_v19 = vsub.f32 %v370_v0, %v376_v12 }
  0xff   : > { %v375_v13 = vpop.xlane.xlu0 %374 }
 0x100   : > { %v377_v15 = vmul.f32 0.03125, %v375_v13 }
 0x102   : > { %v379_v16 = vsub.f32 %v377_v15, %v378_v14 }
 0x104   : > { %v380_v17 = vmax.f32 %v379_v16, 0.0 }
 0x106   : > { %v381_v18 = vadd.f32 1e-05, %v380_v17 }
 0x108   : > { %972 = vrsqrt.f32 %v381_v18 }
 0x112   : > { %v973_v20 = vpop.eup %972 }
 0x113   : > { %v384_v22 = vmul.f32 %v973_v20, %v383_v19 }
 0x115   : > { %v392_v24 = vmul.f32 %v787_v21, %v384_v22 }
 0x117   : > { %v400_v25 = vadd.f32 %v788_v23, %v392_v24 }
 0x119   : > { %v401_v26 = vpack.c.bf16 %v400_v25, %v400_v25 }
 0x11b   : > { %402 = vst [vmem:[#allocation2] sm:$0xf] %v401_v26 }
 0x122   : > { %v404_v27 = vld [vmem:[#allocation2] sm:$0xf] }
 0x123   : > { %846 = vmatmul.mubr.bf16.vlgmr.msra.gmra.mrb[0].mxu0 %v404_v27 }
 0x1f6   : > { %v510_v37 = vpop.f32.mrb[0].mxu0 }
 0x1f7   : > { %v511_v38 = vadd.f32 %v789_v36, %v510_v37  ;;  %v847_v39 = vpop.f32.mrb[1].mxu0 }
 0x1f8   : > { %v513_v40 = vpop.f32.mrb[2].mxu0 }
 0x1f9   : > { %v516_v41 = vmul.f32 %v511_v38, %v511_v38  ;;  %v848_v42 = vpop.f32.mrb[3].mxu0 }
 0x1fb   : > { %v517_v43 = vmul.f32 %v516_v41, %v511_v38 }
 0x1fd   : > { %v518_v44 = vmul.f32 0.044715, %v517_v43 }
 0x1ff   : > { %v519_v45 = vadd.f32 %v518_v44, %v511_v38 }
 0x201   : > { %v520_v46 = vmul.f32 0.7978846, %v519_v45 }
 0x203   : > { %974 = vtanh.f32 %v520_v46 }
 0x20d   : > { %v975_v47 = vpop.eup %974 }
 0x20e   : > { %v522_v48 = vadd.f32 1.0, %v975_v47 }
 0x210   : > { %v523_v49 = vmul.f32 0.5, %v522_v48 }
 0x212   : > { %v524_v50 = vmul.f32 %v523_v49, %v511_v38 }
 0x214   : > { %v526_v51 = vpack.c.bf16 %v524_v50, %v524_v50 }
 0x216   : > { %866 = vmatmul.mubr.bf16.vlgmr.msra.gmra.mrb[0].mxu1 %v526_v51 }
 0x2e9   : > { %v625_v53 = vpop.f32.mrb[0].mxu1 }
 0x2ea   : > { %v644_v54 = vadd.f32 %v806_v52, %v625_v53  ;;  %v867_v55 = vpop.f32.mrb[1].mxu1 }
 0x2eb   : > { %v628_v56 = vpop.f32.mrb[2].mxu1 }
 0x2ec   : > { %645 = vst [vmem:[%s360_s22] sm:$0xff] %v644_v54  ;;  %v868_v57 = vpop.f32.mrb[3].mxu1 }
 0x2ed   : > { %1075 = shalt.err (!%p1072_p11)
}
 0x2ee   : > { %s1076_s21 = scalar_lea.hbm %s1433_s9, 128  ;;  %s1080_s12 = scalar_lea.hbm %s1489_s7, 256 }
 0x2ef   : > { %p1077_p0 = scmp.ne.s32.totalorder %s1433_s9, %s1076_s21  ;;  %p1081_p6 = scmp.lt.u32.totalorder %s1433_s9, %s1489_s7 }
 0x2f0   : > { %p1082_p7 = scmp.lt.u32.totalorder %s1080_s12, %s1076_s21  ;;  %p1084_p8 = scmp.lt.u32.totalorder %s1076_s21, %s1433_s9 }
 0x2f1   : > { %p1078_p4 = pnand %p1077_p0, %p1508_p12 }
 0x2f2   : > { %p1083_p2 = por %p1082_p7, %p1081_p6 }
 0x2f3   : > { %p1079_p13 = pneg %p1078_p4 }
 0x2f4   : > { %p1085_p1 = por %p1084_p8, %p1083_p2 }
 0x2f6   : > { %p1086_p10 = pnand %p1085_p1, %p1079_p13 }
 0x2f8   : > { %1089 = shalt.err (!%p1086_p10)
}
 0x2f9   : > { %879 = dma.vmem_to_hbm [thread:$0]  (%p1508_p12), %s1435_s18, 128, %s1433_s9, %s647_s27  }
 0x2fa PF: > { %s1509_s22 = sld [smem:[#allocation14_spill]]  ;;  %s1510_s30 = sld [smem:[#allocation15_spill]] }
 0x2fb   : > { %p1512_p5 = scmp.ge.s32.totalorder %s1148_s29, 2 }
 0x300   : > { %s672_s8 = sand.u32 1, %s1509_s22   ;;  %p1511_p3 = scmp.ne.s32.totalorder %s1510_s30, 0 }
 0x301   : > { %s673_s11 = scalar_lea.sflag [#allocation6], %s672_s8 }
 0x302   : > { %p893_p9 = pnand %p1512_p5, %p1511_p3 }
 0x304   : > { %1123 = dma.done.wait (!%p893_p9), %s673_s11, 128  }
 0x305   : > { %1125 = vsyncadd (!%p893_p9), %s673_s11, 4294967168  ;;  %s24_s29 = sadd.s32 1, %s1148_s29   ;;  %s1513_s24 = smov %s1132_s25 }
 0x306   : > { %p21_p11 = scmp.ge.s32.totalorder %s24_s29, 4   ;;  %s1514_s25 = smov %s1136_s26 }
 0x307   : > { %s1515_s26 = smov %s1340_s19  ;;  %s1516_s27 = smov %s1144_s28 }
 0x308   : > { %s1517_s28 = smov %s1519_s20  ;;  %23 = sbr.rel (!%p21_p11) target bundleno = 7 (0x7), region = 114 }
 0x30f   :  { %678 = vsyncpa [#allocation5], 1 }
 0x310   :  { %680 = vsyncpa [#allocation5 + $0x1], 1 }
 0x311   :  { %681 = vsyncpa [#allocation8], 1 }
 0x312   :  { %682 = vsyncpa [#allocation6], 1 }
 0x313   :  { %684 = vsyncpa [#allocation6 + $0x1], 1 }

</bundles_post_ra>
